<compile_context>
chip_gen: v6e
topology: v6e:2x2x1
jax: 0.10.0
libtpu: 0.0.40
codegen_flags: <defaults>
</compile_context>

<pallas_src>
import functools

import jax
import jax.numpy as jnp
from jax.experimental import pallas as pl
from jax.experimental.pallas import tpu as pltpu


def _round_up(v, m):
    return (v + m - 1) // m * m


def _vmem_budget_bytes():
    """Generation-aware VMEM budget (75% of physical, conservative fallback)."""
    try:
        cap = int(pltpu.get_tpu_info().vmem_capacity_bytes)
    except Exception:
        cap = 64 * 1024 * 1024  # assume the smallest (v7x per-TC) if unknown
    return (cap * 3) // 4


# --------------------------- projection kernel ----------------------------- #
def _project_kernel(x_ref, w_ref, q_ref, p_ref, *, op):
    """Per-row-tile projection: [Q | P] = X_rows @ [W0 | W1].

    x_ref: (tm, Fp)      bf16
    w_ref: (Fp, 2*Op)    bf16   lane-stacked [W0 | W1]
    q_ref: (tm, Op)      f32    row-local term  X W0
    p_ref: (tm, Op)      bf16   propagated term X W1 (fed to A @ P)
    """
    h = jnp.dot(x_ref[...], w_ref[...], preferred_element_type=jnp.float32)
    q_ref[...] = h[:, :op]
    p_ref[...] = h[:, op:].astype(jnp.bfloat16)


def _project(x_pad, w_cat, *, tm, vmem_cap):
    np_, fp = x_pad.shape
    two_op = w_cat.shape[1]
    op = two_op // 2
    assert w_cat.shape[0] == fp
    assert np_ % tm == 0 and fp % 128 == 0 and op % 128 == 0

    need = (2 * tm * fp * 2          # X row tile (double-buffered, bf16)
            + 2 * fp * two_op * 2    # stacked weights
            + 2 * tm * op * 4        # Q out
            + 2 * tm * op * 2)       # P out
    vmem_limit = int(min(max(2 * need, 4 << 20), vmem_cap))

    ce = pl.CostEstimate(
        flops=2 * np_ * fp * two_op,
        transcendentals=0,
        bytes_accessed=np_ * fp * 2 + fp * two_op * 2 + np_ * op * (4 + 2),
    )

    return pl.pallas_call(
        functools.partial(_project_kernel, op=op),
        out_shape=(jax.ShapeDtypeStruct((np_, op), jnp.float32),
                   jax.ShapeDtypeStruct((np_, op), jnp.bfloat16)),
        grid=(np_ // tm,),
        in_specs=[
            pl.BlockSpec((tm, fp), lambda i: (i, 0)),       # X rows
            pl.BlockSpec((fp, two_op), lambda i: (0, 0)),   # [W0 | W1]
        ],
        out_specs=(
            pl.BlockSpec((tm, op), lambda i: (i, 0)),
            pl.BlockSpec((tm, op), lambda i: (i, 0)),
        ),
        compiler_params=pltpu.CompilerParams(
            dimension_semantics=("parallel",),
            vmem_limit_bytes=vmem_limit,
        ),
        cost_estimate=ce,
    )(x_pad, w_cat)


# --------------------------- propagation kernel ---------------------------- #
def _prop_kernel(a_ref, p_ref, q_ref, o_ref, acc_ref, *, relu):
    """One K-tile step of  OUT_rows = act( A_rows @ P + Q_rows ).

    a_ref : (tm, tk)  bf16   A row/K tile
    p_ref : (tk, Op)  bf16   projected matrix K tile (X W1)
    q_ref : (tm, Op)  f32    row-local term (X W0), constant across K
    o_ref : (tm, Op)         output rows (written on last K step)
    acc   : (tm, Op)  f32    VMEM accumulator, resident across K
    """
    k = pl.program_id(1)

    @pl.when(k == 0)
    def _():
        acc_ref[...] = q_ref[...]

    acc_ref[...] += jnp.dot(a_ref[...], p_ref[...],
                            preferred_element_type=jnp.float32)

    @pl.when(k == pl.num_programs(1) - 1)
    def _():
        h = acc_ref[...]
        if relu:
            h = jnp.maximum(h, 0.0)
        o_ref[...] = h.astype(o_ref.dtype)


def _propagate(a_pad, p, q, *, tm, tk, out_dtype, relu, vmem_cap):
    np_ = a_pad.shape[0]
    op = p.shape[1]
    assert a_pad.shape == (np_, np_)
    assert p.shape == (np_, op) and q.shape == (np_, op)
    assert np_ % tm == 0 and np_ % tk == 0 and op % 128 == 0

    out_isz = jnp.dtype(out_dtype).itemsize
    need = (2 * tm * tk * 2          # A tile (double-buffered, bf16)
            + 2 * tk * op * 2        # P K-tile
            + 2 * tm * op * 4        # Q row tile (f32)
            + 2 * tm * op * out_isz  # output rows
            + tm * op * 4)           # f32 accumulator scratch
    vmem_limit = int(min(max(2 * need, 4 << 20), vmem_cap))

    ce = pl.CostEstimate(
        flops=2 * np_ * np_ * op,
        transcendentals=0,
        bytes_accessed=(np_ * np_ * 2                 # A streamed once
                        + (np_ // tm) * np_ * op * 2  # P streamed per row block
                        + np_ * op * 4                # Q
                        + np_ * op * out_isz),        # output
    )

    return pl.pallas_call(
        functools.partial(_prop_kernel, relu=relu),
        out_shape=jax.ShapeDtypeStruct((np_, op), out_dtype),
        grid=(np_ // tm, np_ // tk),                  # rows (parallel) x K (arbitrary)
        in_specs=[
            pl.BlockSpec((tm, tk), lambda i, k: (i, k)),   # A tile
            pl.BlockSpec((tk, op), lambda i, k: (k, 0)),   # P K-tile
            pl.BlockSpec((tm, op), lambda i, k: (i, 0)),   # Q rows (constant in k)
        ],
        out_specs=pl.BlockSpec((tm, op), lambda i, k: (i, 0)),
        scratch_shapes=[pltpu.VMEM((tm, op), jnp.float32)],
        compiler_params=pltpu.CompilerParams(
            dimension_semantics=("parallel", "arbitrary"),
            vmem_limit_bytes=vmem_limit,
        ),
        cost_estimate=ce,
    )(a_pad, p, q)


# ------------------------------- wrapper ----------------------------------- #
def first_order_gcn(x, a_norm, w0_1, w1_1, w0_2, w1_2):
    """Two Pallas layers: projection (X[W0|W1]) then K-tiled A @ P + Q."""
    n, f = x.shape
    h = w0_1.shape[1]
    c = w0_2.shape[1]

    lane = 128
    fp = _round_up(f, lane)
    hp = _round_up(h, lane)
    cp = _round_up(c, lane)

    vmem_cap = _vmem_budget_bytes()
    # Bigger row tiles on 128 MiB chips (v5e/v6e), smaller on v7x (64 MiB VMEM).
    tm_target = 512 if vmem_cap > 64 * 1024 * 1024 else 256

    np_lane = _round_up(n, lane)          # lane / MXU-K aligned node count
    tm = min(tm_target, np_lane)          # multiple of 128 (so also of 16)
    np_ = _round_up(np_lane, tm)          # tm divides np_, stays lane aligned
    tk = tm

    # Pad + cast MXU operands to bf16 (zero padding is exact for this model).
    a_pad = jnp.zeros((np_, np_), jnp.float32).at[:n, :n].set(a_norm)
    a_pad = a_pad.astype(jnp.bfloat16)
    x_pad = jnp.zeros((np_, fp), jnp.float32).at[:n, :f].set(x)
    x_pad = x_pad.astype(jnp.bfloat16)

    # Lane-stacked weights [W0 | W1] per layer (zero padded).
    w1_cat = (
        jnp.zeros((fp, 2 * hp), jnp.float32)
        .at[:f, :h].set(w0_1)
        .at[:f, hp:hp + h].set(w1_1)
        .astype(jnp.bfloat16)
    )
    w2_cat = (
        jnp.zeros((hp, 2 * cp), jnp.float32)
        .at[:h, :c].set(w0_2)
        .at[:h, cp:cp + c].set(w1_2)
        .astype(jnp.bfloat16)
    )

    # Layer 1: H1 = ReLU( X W0_1 + A (X W1_1) )
    q1, p1 = _project(x_pad, w1_cat, tm=tm, vmem_cap=vmem_cap)
    h1_pad = _propagate(a_pad, p1, q1, tm=tm, tk=tk,
                        out_dtype=jnp.bfloat16, relu=True, vmem_cap=vmem_cap)

    # Layer 2: OUT = H1 W0_2 + A (H1 W1_2)
    q2, p2 = _project(h1_pad, w2_cat, tm=tm, vmem_cap=vmem_cap)
    out_pad = _propagate(a_pad, p2, q2, tm=tm, tk=tk,
                         out_dtype=jnp.float32, relu=False, vmem_cap=vmem_cap)
    return out_pad[:n, :c]


# ------------------------------ JAX glue ----------------------------------- #
def build_a_norm(edge_index_with_loops, deg_inv_sqrt, num_nodes):
    """Dense D^{-1/2} (A + I) D^{-1/2}; equivalent to spmm's propagation matrix."""
    src = edge_index_with_loops[0]
    dst = edge_index_with_loops[1]
    vals = deg_inv_sqrt[dst] * deg_inv_sqrt[src]
    a = jnp.zeros((num_nodes, num_nodes), dtype=jnp.float32)
    a = a.at[dst, src].add(vals)
    return a


def reference_forward(x, a_norm, w0_1, w1_1, w0_2, w1_2):
    ax = a_norm @ x
    h1 = jax.nn.relu(x @ w0_1 + ax @ w1_1)
    ah1 = a_norm @ h1
    return h1 @ w0_2 + ah1 @ w1_2


# ------------------------------- main -------------------------------------- #
if __name__ == "__main__":
    key = jax.random.PRNGKey(0)

    num_nodes = 64
    in_channels = 16
    hidden_channels = 32
    out_channels = 8
    num_rand_edges = 256

    k_x, k_e1, k_e2, k_w01, k_w11, k_w02, k_w12 = jax.random.split(key, 7)

    # Node features
    x = jax.random.normal(k_x, (num_nodes, in_channels), dtype=jnp.float32)

    # Random directed edges + self loops  (edge_index_with_loops: [2, E])
    src = jax.random.randint(k_e1, (num_rand_edges,), 0, num_nodes)
    dst = jax.random.randint(k_e2, (num_rand_edges,), 0, num_nodes)
    loops = jnp.arange(num_nodes)
    edge_index_with_loops = jnp.stack(
        [jnp.concatenate([src, loops]), jnp.concatenate([dst, loops])], axis=0
    ).astype(jnp.int32)

    # Degree (in-degree over edges-with-loops) and its inverse sqrt
    deg = jnp.zeros((num_nodes,), jnp.float32).at[edge_index_with_loops[1]].add(1.0)
    deg_inv_sqrt = jnp.where(deg > 0, 1.0 / jnp.sqrt(deg), 0.0)

    # Parameters: torch.randn(...) * 0.01, deterministic here via PRNGKey(0) splits
    w0_1 = 0.01 * jax.random.normal(k_w01, (in_channels, hidden_channels), jnp.float32)
    w1_1 = 0.01 * jax.random.normal(k_w11, (in_channels, hidden_channels), jnp.float32)
    w0_2 = 0.01 * jax.random.normal(k_w02, (hidden_channels, out_channels), jnp.float32)
    w1_2 = 0.01 * jax.random.normal(k_w12, (hidden_channels, out_channels), jnp.float32)

    # Dense normalized adjacency (glue; equivalent to spmm's propagation)
    a_norm = build_a_norm(edge_index_with_loops, deg_inv_sqrt, num_nodes)

    out = first_order_gcn(x, a_norm, w0_1, w1_1, w0_2, w1_2)
    out = jax.block_until_ready(out)

    ref = reference_forward(x, a_norm, w0_1, w1_1, w0_2, w1_2)
    assert out.shape == (num_nodes, out_channels)
    # bf16 MXU inputs -> looser tolerance than an f32-everywhere check.
    assert jnp.allclose(out, ref, atol=2e-3, rtol=2e-2), "mismatch vs reference"

    print("KERNEL_OK")
</pallas_src>

<mosaic_0001>
module attributes {stable_mosaic.version = 11 : i64} {
  func.func @_project_kernel(%arg0: i32, %arg1: memref<128x128xbf16, #tpu.memory_space<vmem>>, %arg2: memref<128x256xbf16, #tpu.memory_space<vmem>>, %arg3: memref<128x128xf32, #tpu.memory_space<vmem>>, %arg4: memref<128x128xbf16, #tpu.memory_space<vmem>>) attributes {dimension_semantics = [#tpu.dimension_semantics<parallel>], iteration_bounds = array<i64: 1>, scalar_prefetch = 0 : i64, scratch_operands = 0 : i64, tpu.core_type = #tpu.core_type<tc>, window_params = [{transform_indices = @transform_0, window_bounds = array<i64: 128, 128>}, {pipeline_mode = #tpu.pipeline_mode<synchronous>, transform_indices = @transform_1, window_bounds = array<i64: 128, 256>}, {transform_indices = @transform_2, window_bounds = array<i64: 128, 128>}, {transform_indices = @transform_3, window_bounds = array<i64: 128, 128>}]} {
    %c0 = arith.constant 0 : index
    %c0_0 = arith.constant 0 : index
    %0 = vector.load %arg1[%c0, %c0_0] : memref<128x128xbf16, #tpu.memory_space<vmem>>, vector<128x128xbf16>
    %c0_1 = arith.constant 0 : index
    %c0_2 = arith.constant 0 : index
    %1 = vector.load %arg2[%c0_1, %c0_2] : memref<128x256xbf16, #tpu.memory_space<vmem>>, vector<128x256xbf16>
    %cst = arith.constant dense<0.000000e+00> : vector<128x256xf32>
    %2 = tpu.matmul %0, %1, %cst {dimension_numbers = #tpu.dot_dimension_numbers<[1], [0], [0], [1], [0, 0, 1, 1], [], []>} : vector<128x128xbf16>, vector<128x256xbf16>, vector<128x256xf32> -> vector<128x256xf32>
    %3 = vector.extract_strided_slice %2 {offsets = [0, 0], sizes = [128, 128], strides = [1, 1]} : vector<128x256xf32> to vector<128x128xf32>
    %c0_3 = arith.constant 0 : index
    %c0_4 = arith.constant 0 : index
    %4 = vector.load %arg3[%c0_3, %c0_4] : memref<128x128xf32, #tpu.memory_space<vmem>>, vector<128x128xf32>
    tpu.vector_store %arg3[%c0_3, %c0_4], %3 {strides = array<i32>} : memref<128x128xf32, #tpu.memory_space<vmem>>, vector<128x128xf32>,
    %5 = vector.extract_strided_slice %2 {offsets = [0, 128], sizes = [128, 128], strides = [1, 1]} : vector<128x256xf32> to vector<128x128xf32>
    %6 = arith.truncf %5 : vector<128x128xf32> to vector<128x128xbf16>
    %c0_5 = arith.constant 0 : index
    %c0_6 = arith.constant 0 : index
    %7 = vector.load %arg4[%c0_5, %c0_6] : memref<128x128xbf16, #tpu.memory_space<vmem>>, vector<128x128xbf16>
    tpu.vector_store %arg4[%c0_5, %c0_6], %6 {strides = array<i32>} : memref<128x128xbf16, #tpu.memory_space<vmem>>, vector<128x128xbf16>,
    return
  }
  func.func @transform_0(%arg0: i32) -> (i32, i32) {
    %c0_i32 = arith.constant 0 : i32
    %c0_i32_0 = arith.constant 0 : i32
    return %arg0, %c0_i32 : i32, i32
  }
  func.func @transform_1(%arg0: i32) -> (i32, i32) {
    %c0_i32 = arith.constant 0 : i32
    %c0_i32_0 = arith.constant 0 : i32
    %c0_i32_1 = arith.constant 0 : i32
    return %c0_i32, %c0_i32_0 : i32, i32
  }
  func.func @transform_2(%arg0: i32) -> (i32, i32) {
    %c0_i32 = arith.constant 0 : i32
    %c0_i32_0 = arith.constant 0 : i32
    return %arg0, %c0_i32 : i32, i32
  }
  func.func @transform_3(%arg0: i32) -> (i32, i32) {
    %c0_i32 = arith.constant 0 : i32
    %c0_i32_0 = arith.constant 0 : i32
    return %arg0, %c0_i32 : i32, i32
  }
}

</mosaic_0001>

<bundles_post_ra>
// kernel: tpu_custom_call.1
= control target key start
LH: loop header
LB: loop body
LE: loop exit
PB: predicated region body
PF: predicated region fallthrough
CT: control target
= control target key end

     0   :  { %9 = vsyncpa [#allocation3], 0  ;;  %s756_s0 = inlined_call_operand.hbm [shape: bf16[128,128], index: 0, kind: input, shape index: {}]   ;;  %s757_s1 = inlined_call_operand.hbm [shape: bf16[128,256], index: 1, kind: input, shape index: {}]   ;;  %s758_s2 = inlined_call_operand.hbm [shape: f32[128,128], index: 2, kind: output, shape index: {0}]   ;;  %s759_s3 = inlined_call_operand.hbm [shape: bf16[128,128], index: 3, kind: output, shape index: {1}]  }
   0x1   :  { %10 = vsyncpa [#allocation6], 0 }
   0x2   :  { %11 = vsyncpa [#allocation4], 0 }
   0x3   :  { %12 = vsyncpa [#allocation9], 0  ;;  %s695_s12 = smov [#allocation2]  }
   0x4   :  { %s18_s13 = sshll.u32 %s695_s12, 4  ;;  %s19_s13 = int_to_ptr.vmem [resolvable:$true] %s18_s13 }
   0x5   :  { %s615_s14 = scalar_lea.vmem %s19_s13, 1024  ;;  %p620_p1 = scmp.lt.s32.totalorder %s19_s13, %s19_s13 }
   0x6   :  { %p616_p0 = scmp.ne.s32.totalorder %s19_s13, %s615_s14  ;;  %p621_p2 = scmp.lt.s32.totalorder %s615_s14, %s615_s14 }
   0x8   :  { %p622_p3 = por %p621_p2, %p620_p1 }
   0xa   :  { %p623_p4 = pnand %p622_p3, %p616_p0 }
   0xc   :  { %626 = shalt.err (!%p623_p4)
}
   0xd   :  { %s696_s15 = smov 64   ;;  %s697_s16 = smov 4  }
   0xe   :  { %24 = dma.hbm_to_vmem [thread:$0]  %s756_s0, 1024, %s19_s13, [#allocation3], %s696_s15, %s696_s15, %s697_s16  }
   0xf   :  { %s698_s19 = smov [#allocation5]  }
  0x10   :  { %s30_s20 = sshll.u32 %s698_s19, 4  ;;  %s31_s20 = int_to_ptr.vmem [resolvable:$true] %s30_s20 }
  0x11   :  { %s635_s21 = scalar_lea.vmem %s31_s20, 2048  ;;  %p640_p6 = scmp.lt.s32.totalorder %s31_s20, %s31_s20 }
  0x12   :  { %p636_p5 = scmp.ne.s32.totalorder %s31_s20, %s635_s21  ;;  %p641_p7 = scmp.lt.s32.totalorder %s635_s21, %s635_s21 }
  0x14   :  { %p642_p8 = por %p641_p7, %p640_p6 }
  0x16   :  { %p643_p9 = pnand %p642_p8, %p636_p5 }
  0x18   :  { %646 = shalt.err (!%p643_p9)
}
  0x19   :  { %s699_s22 = smov 128   ;;  %s700_s23 = smov 8  }
  0x1a   :  { %36 = dma.hbm_to_vmem [thread:$0]  %s757_s1, 2048, %s31_s20, [#allocation6], %s699_s22, %s699_s22, %s700_s23  }
  0x1b   :  { %687 = dma.done.wait [#allocation3], 1024  }
  0x1c   :  { %688 = vsyncadd [#allocation3], 4294966272 }
  0x1d   :  { %689 = dma.done.wait [#allocation6], 2048  }
  0x1e   :  { %690 = vsyncadd [#allocation6], 4294965248  ;;  %v701_v0 = vmov 0   ;;  %v575_v1 = vld [vmem:[#allocation5 + $0x74] ss:$8 sps:$4 sm:$0xff]   ;;  %v599_v17 = vld [vmem:[#allocation2] sm:$0xff]  }
  0x1f   :  { %236 = vmatprep.mubr.bf16.mxu0 %v701_v0  ;;  %276 = vmatprep.mubr.bf16.mxu1 %v701_v0  ;;  %v577_v2 = vld [vmem:[#allocation5 + $0x70] ss:$8 sps:$4 sm:$0xff]   ;;  %v578_v3 = vld [vmem:[#allocation5 + $0x64] ss:$8 sps:$4 sm:$0xff]   ;;  %v580_v4 = vld [vmem:[#allocation5 + $0x60] ss:$8 sps:$4 sm:$0xff]  }
  0x20   :  { %204 = vmatprep.subr.bf16.mxu0 %v575_v1  ;;  %550 = vmatprep.subr.bf16.mxu1 %v575_v1  ;;  %v581_v5 = vld [vmem:[#allocation5 + $0x54] ss:$8 sps:$4 sm:$0xff]   ;;  %v583_v6 = vld [vmem:[#allocation5 + $0x50] ss:$8 sps:$4 sm:$0xff]   ;;  %v584_v7 = vld [vmem:[#allocation5 + $0x44] ss:$8 sps:$4 sm:$0xff]  }
  0x21   :  { %205 = vmatpush1.bf16.msra.mxu0 %v577_v2  ;;  %558 = vmatpush1.bf16.msra.mxu1 %v577_v2  ;;  %v586_v8 = vld [vmem:[#allocation5 + $0x40] ss:$8 sps:$4 sm:$0xff]   ;;  %v587_v9 = vld [vmem:[#allocation5 + $0x34] ss:$8 sps:$4 sm:$0xff]   ;;  %v589_v10 = vld [vmem:[#allocation5 + $0x30] ss:$8 sps:$4 sm:$0xff]  }
  0x22   :  { %206 = vmatprep.subr.bf16.mxu0 %v578_v3  ;;  %551 = vmatprep.subr.bf16.mxu1 %v578_v3  ;;  %v590_v11 = vld [vmem:[#allocation5 + $0x24] ss:$8 sps:$4 sm:$0xff]   ;;  %v592_v12 = vld [vmem:[#allocation5 + $0x20] ss:$8 sps:$4 sm:$0xff]   ;;  %v593_v13 = vld [vmem:[#allocation5 + $0x14] ss:$8 sps:$4 sm:$0xff]  }
  0x23   :  { %v595_v14 = vld [vmem:[#allocation5 + $0x10] ss:$8 sps:$4 sm:$0xff]   ;;  %v596_v15 = vld [vmem:[#allocation5 + $0x4] ss:$8 sps:$4 sm:$0xff]   ;;  %v598_v16 = vld [vmem:[#allocation5] ss:$8 sps:$4 sm:$0xff]  }
  0x24   :  { %v600_v18 = vld [vmem:[#allocation2 + $0x20] sm:$0xff]   ;;  %v601_v19 = vld [vmem:[#allocation2 + $0x8] sm:$0xff]   ;;  %v603_v21 = vld [vmem:[#allocation2 + $0x10] sm:$0xff]   ;;  %s702_s0 = smov [#allocation7]   ;;  %s703_s26 = smov [#allocation8]  }
  0x25   :  { %207 = vmatpush1.bf16.msra.mxu0 %v580_v4  ;;  %559 = vmatpush1.bf16.msra.mxu1 %v580_v4  ;;  %v602_v20 = vld [vmem:[#allocation2 + $0x28] sm:$0xff]   ;;  %v604_v22 = vld [vmem:[#allocation2 + $0x30] sm:$0xff]   ;;  %v605_v23 = vld [vmem:[#allocation2 + $0x18] sm:$0xff]   ;;  %s418_s1 = sshll.u32 %s702_s0, 4  ;;  %s430_s27 = sshll.u32 %s703_s26, 4  ;;  %s419_s1 = int_to_ptr.vmem [resolvable:$true] %s418_s1  ;;  %s431_s27 = int_to_ptr.vmem [resolvable:$true] %s430_s27 }
  0x26   :  { %208 = vmatprep.subr.bf16.mxu0 %v581_v5  ;;  %552 = vmatprep.subr.bf16.mxu1 %v581_v5  ;;  %v606_v24 = vld [vmem:[#allocation2 + $0x38] sm:$0xff]   ;;  %s647_s28 = scalar_lea.vmem %s419_s1, 2048  ;;  %p652_p11 = scmp.lt.s32.totalorder %s419_s1, %s419_s1 }
  0x27   :  { %p648_p10 = scmp.ne.s32.totalorder %s419_s1, %s647_s28  ;;  %p653_p12 = scmp.lt.s32.totalorder %s647_s28, %s647_s28 }
  0x29   :  { %209 = vmatpush1.bf16.msra.mxu0 %v583_v6  ;;  %560 = vmatpush1.bf16.msra.mxu1 %v583_v6  ;;  %p654_p13 = por %p653_p12, %p652_p11 }
  0x2a   :  { %210 = vmatprep.subr.bf16.mxu0 %v584_v7  ;;  %553 = vmatprep.subr.bf16.mxu1 %v584_v7 }
  0x2b   :  { %p655_p0 = pnand %p654_p13, %p648_p10 }
  0x2d   :  { %211 = vmatpush1.bf16.msra.mxu0 %v586_v8  ;;  %561 = vmatpush1.bf16.msra.mxu1 %v586_v8 }
  0x2e   :  { %212 = vmatprep.subr.bf16.mxu0 %v587_v9  ;;  %554 = vmatprep.subr.bf16.mxu1 %v587_v9 }
  0x31   :  { %213 = vmatpush1.bf16.msra.mxu0 %v589_v10  ;;  %562 = vmatpush1.bf16.msra.mxu1 %v589_v10 }
  0x32   :  { %214 = vmatprep.subr.bf16.mxu0 %v590_v11  ;;  %555 = vmatprep.subr.bf16.mxu1 %v590_v11 }
  0x35   :  { %215 = vmatpush1.bf16.msra.mxu0 %v592_v12  ;;  %563 = vmatpush1.bf16.msra.mxu1 %v592_v12 }
  0x36   :  { %216 = vmatprep.subr.bf16.mxu0 %v593_v13  ;;  %556 = vmatprep.subr.bf16.mxu1 %v593_v13 }
  0x39   :  { %217 = vmatpush1.bf16.msra.mxu0 %v595_v14  ;;  %564 = vmatpush1.bf16.msra.mxu1 %v595_v14 }
  0x3a   :  { %218 = vmatprep.subr.bf16.mxu0 %v596_v15  ;;  %557 = vmatprep.subr.bf16.mxu1 %v596_v15 }
  0x3d   :  { %219 = vmatpush1.bf16.msra.mxu0 %v598_v16  ;;  %565 = vmatpush1.bf16.msra.mxu1 %v598_v16 }
  0x40   :  { %237 = vmatmul.mubr.bf16.vlgmr.msra.gmra.mxu0 %v599_v17  ;;  %277 = vmatmul.mubr.bf16.vlgmr.msra.gmra.mxu1 %v600_v18 }
  0x41   :  { %246 = vmatprep.mubr.bf16.mxu0 %v701_v0  ;;  %286 = vmatprep.mubr.bf16.mxu1 %v701_v0 }
  0x48   :  { %247 = vmatmul.mubr.bf16.gmra.mxu0 %v601_v19  ;;  %287 = vmatmul.mubr.bf16.gmra.mxu1 %v602_v20 }
  0x49   :  { %256 = vmatprep.mubr.bf16.mxu0 %v701_v0  ;;  %296 = vmatprep.mubr.bf16.mxu1 %v701_v0 }
  0x50   :  { %257 = vmatmul.mubr.bf16.gmra.mxu0 %v603_v21  ;;  %297 = vmatmul.mubr.bf16.gmra.mxu1 %v604_v22 }
  0x51   :  { %266 = vmatprep.mubr.bf16.mxu0 %v701_v0  ;;  %306 = vmatprep.mubr.bf16.mxu1 %v701_v0 }
  0x58   :  { %267 = vmatmul.mubr.bf16.gmra.mxu0 %v605_v23  ;;  %307 = vmatmul.mubr.bf16.gmra.mxu1 %v606_v24 }
 0x100   :  { %v238_v25 = vpop.f32.mrf.mxu0  ;;  %v278_v26 = vpop.f32.mrf.mxu1 }
 0x101   :  { %317 = vst [vmem:[#allocation7] sm:$0xff] %v238_v25  ;;  %325 = vst [vmem:[#allocation7 + $0x40] sm:$0xff] %v278_v26 }
 0x102   :  { %v240_v27 = vpop.f32.mrf.mxu0  ;;  %v280_v28 = vpop.f32.mrf.mxu1 }
 0x104   :  { %v242_v29 = vpop.f32.mrf.mxu0  ;;  %v282_v30 = vpop.f32.mrf.mxu1 }
 0x105   :  { %318 = vst [vmem:[#allocation7 + $0x8] sm:$0xff] %v242_v29  ;;  %326 = vst [vmem:[#allocation7 + $0x48] sm:$0xff] %v282_v30 }
 0x106   :  { %v244_v31 = vpop.f32.mrf.mxu0  ;;  %v284_v32 = vpop.f32.mrf.mxu1 }
 0x107   :  { %v506_v33 = vpack.c.bf16 %v244_v31, %v240_v27  ;;  %v526_v34 = vpack.c.bf16 %v284_v32, %v280_v28 }
 0x108   :  { %v248_v35 = vpop.f32.mrf.mxu0  ;;  %v288_v36 = vpop.f32.mrf.mxu1 }
 0x109   :  { %507 = vst [vmem:[#allocation8] sm:$0xff] %v506_v33   ;;  %546 = vst [vmem:[#allocation8 + $0x20] sm:$0xff] %v526_v34  }
 0x10a   :  { %319 = vst [vmem:[#allocation7 + $0x10] sm:$0xff] %v248_v35  ;;  %327 = vst [vmem:[#allocation7 + $0x50] sm:$0xff] %v288_v36  ;;  %v250_v37 = vpop.f32.mrf.mxu0  ;;  %v290_v38 = vpop.f32.mrf.mxu1 }
 0x10c   :  { %v252_v39 = vpop.f32.mrf.mxu0  ;;  %v292_v40 = vpop.f32.mrf.mxu1 }
 0x10d   :  { %320 = vst [vmem:[#allocation7 + $0x18] sm:$0xff] %v252_v39  ;;  %328 = vst [vmem:[#allocation7 + $0x58] sm:$0xff] %v292_v40 }
 0x10e   :  { %v254_v41 = vpop.f32.mrf.mxu0  ;;  %v294_v42 = vpop.f32.mrf.mxu1 }
 0x10f   :  { %v511_v43 = vpack.c.bf16 %v254_v41, %v250_v37  ;;  %v531_v44 = vpack.c.bf16 %v294_v42, %v290_v38 }
 0x110   :  { %v258_v45 = vpop.f32.mrf.mxu0  ;;  %v298_v46 = vpop.f32.mrf.mxu1 }
 0x111   :  { %543 = vst [vmem:[#allocation8 + $0x8] sm:$0xff] %v511_v43   ;;  %547 = vst [vmem:[#allocation8 + $0x28] sm:$0xff] %v531_v44  }
 0x112   :  { %321 = vst [vmem:[#allocation7 + $0x20] sm:$0xff] %v258_v45  ;;  %329 = vst [vmem:[#allocation7 + $0x60] sm:$0xff] %v298_v46  ;;  %v260_v47 = vpop.f32.mrf.mxu0  ;;  %v300_v48 = vpop.f32.mrf.mxu1 }
 0x114   :  { %v262_v49 = vpop.f32.mrf.mxu0  ;;  %v302_v50 = vpop.f32.mrf.mxu1 }
 0x115   :  { %322 = vst [vmem:[#allocation7 + $0x28] sm:$0xff] %v262_v49  ;;  %330 = vst [vmem:[#allocation7 + $0x68] sm:$0xff] %v302_v50 }
 0x116   :  { %v264_v51 = vpop.f32.mrf.mxu0  ;;  %v304_v52 = vpop.f32.mrf.mxu1 }
 0x117   :  { %v516_v53 = vpack.c.bf16 %v264_v51, %v260_v47  ;;  %v536_v54 = vpack.c.bf16 %v304_v52, %v300_v48 }
 0x118   :  { %v268_v55 = vpop.f32.mrf.mxu0  ;;  %v308_v56 = vpop.f32.mrf.mxu1 }
 0x119   :  { %544 = vst [vmem:[#allocation8 + $0x10] sm:$0xff] %v516_v53   ;;  %548 = vst [vmem:[#allocation8 + $0x30] sm:$0xff] %v536_v54  }
 0x11a   :  { %323 = vst [vmem:[#allocation7 + $0x30] sm:$0xff] %v268_v55  ;;  %331 = vst [vmem:[#allocation7 + $0x70] sm:$0xff] %v308_v56  ;;  %v270_v57 = vpop.f32.mrf.mxu0  ;;  %v310_v58 = vpop.f32.mrf.mxu1 }
 0x11c   :  { %v272_v59 = vpop.f32.mrf.mxu0  ;;  %v312_v60 = vpop.f32.mrf.mxu1 }
 0x11d   :  { %324 = vst [vmem:[#allocation7 + $0x38] sm:$0xff] %v272_v59  ;;  %332 = vst [vmem:[#allocation7 + $0x78] sm:$0xff] %v312_v60 }
 0x11e   :  { %v274_v61 = vpop.f32.mrf.mxu0  ;;  %v314_v62 = vpop.f32.mrf.mxu1 }
 0x11f   :  { %658 = shalt.err (!%p655_p0)
}
 0x120   :  { %424 = dma.vmem_to_hbm [thread:$0]  %s419_s1, 2048, %s758_s2, [#allocation4], %s699_s22, %s699_s22, %s700_s23   ;;  %v521_v63 = vpack.c.bf16 %v274_v61, %v270_v57  ;;  %v541_v0 = vpack.c.bf16 %v314_v62, %v310_v58 }
 0x121   :  { %s667_s4 = scalar_lea.vmem %s431_s27, 1024  ;;  %p672_p2 = scmp.lt.s32.totalorder %s431_s27, %s431_s27 }
 0x122   :  { %545 = vst [vmem:[#allocation8 + $0x18] sm:$0xff] %v521_v63   ;;  %549 = vst [vmem:[#allocation8 + $0x38] sm:$0xff] %v541_v0   ;;  %p668_p1 = scmp.ne.s32.totalorder %s431_s27, %s667_s4  ;;  %p673_p3 = scmp.lt.s32.totalorder %s667_s4, %s667_s4 }
 0x124   :  { %p674_p4 = por %p673_p3, %p672_p2 }
 0x126   :  { %p675_p5 = pnand %p674_p4, %p668_p1 }
 0x128   :  { %678 = shalt.err (!%p675_p5)
}
 0x129   :  { %436 = dma.vmem_to_hbm [thread:$0]  %s431_s27, 1024, %s759_s3, [#allocation9], %s696_s15, %s696_s15, %s697_s16  }
 0x12a   :  { %691 = dma.done.wait [#allocation4], 2048  }
 0x12b   :  { %692 = vsyncadd [#allocation4], 4294965248 }
 0x12c   :  { %693 = dma.done.wait [#allocation9], 1024  }
 0x12d   :  { %694 = vsyncadd [#allocation9], 4294966272 }
 0x12e   :  { %443 = vsyncpa [#allocation3], 1 }
 0x12f   :  { %444 = vsyncpa [#allocation6], 1 }
 0x130   :  { %445 = vsyncpa [#allocation4], 1 }
 0x131   :  { %446 = vsyncpa [#allocation9], 1 }

</bundles_post_ra>
